<compile_context>
chip_gen: v7x
topology: tpu7x:2x2x1
jax: 0.10.0
libtpu: 0.0.40
codegen_flags: <defaults>
</compile_context>

<pallas_src>
import jax
import jax.numpy as jnp
from jax.experimental import pallas as pl
from jax.experimental.pallas import tpu as pltpu

NUM_CLASSES = 1601          # hard-coded in the PyTorch module
TILE_C = 256                # class tile (multiple of 128 -> unmasked stores)
TILE_M = 256                # max row tile


def _round_up(x, m):
    return ((x + m - 1) // m) * m


def _fpn_cls_kernel(x_ref, w_ref, b_ref, o_ref):
    # [TM, H] @ [H, TILE_C] on the MXU with f32 accumulation, + bias, f32 out.
    o_ref[...] = (
        jnp.dot(x_ref[...], w_ref[...], preferred_element_type=jnp.float32)
        + b_ref[...]
    )


def init_params(key, *, representation_size, num_classes=NUM_CLASSES,
                tile_c=TILE_C):
    """cls_score: weight ~ N(0, 0.01), bias = 0 (matches the PyTorch init)."""
    c_pad = _round_up(num_classes, tile_c)
    # nn.Linear stores weight as [out, in]; keep it pre-transposed [in, out]
    # and zero-padded on the class axis so every output tile is lane-dense.
    w = 0.01 * jax.random.normal(key, (num_classes, representation_size),
                                 jnp.float32)
    w_t = jnp.zeros((representation_size, c_pad), jnp.float32)
    w_t = w_t.at[:, :num_classes].set(w.T)
    b = jnp.zeros((1, c_pad), jnp.float32)
    return {
        "w_bf16": w_t.astype(jnp.bfloat16),   # [H, C_pad] MXU operand
        "w_f32": w_t,                         # kept only for the reference
        "b": b,                               # [1, C_pad] f32
        "num_classes": num_classes,
    }


def fpn_predictor_forward(x, params, *, tile_c=TILE_C, tile_m=TILE_M):
    """x: [N, H] or [N, H, 1, 1]  ->  scores [N, num_classes] (f32)."""
    if x.ndim == 4:
        assert x.shape[2] == 1 and x.shape[3] == 1, x.shape
        x = x.reshape(x.shape[0], -1)
    n, h = x.shape
    w, b = params["w_bf16"], params["b"]
    c_pad = w.shape[1]
    num_classes = params["num_classes"]
    assert c_pad % tile_c == 0

    # Pad rows so the row tile obeys the (8, 128) sublane constraint.
    n_pad = _round_up(n, 8)
    tm = n_pad if n_pad <= tile_m else tile_m
    n_pad = _round_up(n_pad, tm)
    x_p = jnp.zeros((n_pad, h), jnp.bfloat16).at[:n].set(x.astype(jnp.bfloat16))

    grid = (n_pad // tm, c_pad // tile_c)
    out = pl.pallas_call(
        _fpn_cls_kernel,
        out_shape=jax.ShapeDtypeStruct((n_pad, c_pad), jnp.float32),
        grid=grid,
        in_specs=[
            pl.BlockSpec((tm, h), lambda i, j: (i, 0)),        # activations
            pl.BlockSpec((h, tile_c), lambda i, j: (0, j)),    # weight tile
            pl.BlockSpec((1, tile_c), lambda i, j: (0, j)),    # bias tile
        ],
        out_specs=pl.BlockSpec((tm, tile_c), lambda i, j: (i, j)),
        compiler_params=pltpu.CompilerParams(
            dimension_semantics=("parallel", "parallel"),
            vmem_limit_bytes=32 * 1024 * 1024,
        ),
    )(x_p, w, b)
    return out[:n, :num_classes]


def _reference_forward(x, params, *, match_kernel_precision=True):
    """Pure-JAX reference mirroring the PyTorch forward."""
    if x.ndim == 4:
        x = x.reshape(x.shape[0], -1)
    c = params["num_classes"]
    b = params["b"][:, :c]
    if match_kernel_precision:
        w = params["w_bf16"][:, :c]
        return jnp.dot(x.astype(jnp.bfloat16), w,
                       preferred_element_type=jnp.float32) + b
    w = params["w_f32"][:, :c]
    return jnp.dot(x, w) + b


if __name__ == "__main__":
    H = 64          # config.hidden_size (representation_size), small demo size
    N = 20          # number of pooled ROI feature vectors

    key = jax.random.PRNGKey(0)
    kw, kx = jax.random.split(key)
    params = init_params(kw, representation_size=H)

    # The module accepts [N, H, 1, 1] (post-pool) or [N, H].
    x2d = jax.random.normal(kx, (N, H), jnp.float32)
    x4d = x2d[:, :, None, None]

    scores = fpn_predictor_forward(x4d, params)
    scores = jax.block_until_ready(scores)
    assert scores.shape == (N, NUM_CLASSES), scores.shape

    # 2-D input path must agree exactly with the 4-D (view) path.
    scores_2d = jax.block_until_ready(fpn_predictor_forward(x2d, params))
    assert jnp.array_equal(scores, scores_2d)

    # Kernel-plumbing check (same bf16 operand / f32-accumulation numerics).
    ref_bf16 = _reference_forward(x4d, params, match_kernel_precision=True)
    assert jnp.allclose(scores, ref_bf16, atol=1e-3, rtol=1e-3), \
        float(jnp.max(jnp.abs(scores - ref_bf16)))

    # Semantic check against the full-f32 Linear (bf16 quantization bound).
    ref_f32 = _reference_forward(x4d, params, match_kernel_precision=False)
    assert jnp.allclose(scores, ref_f32, atol=5e-3, rtol=1e-2), \
        float(jnp.max(jnp.abs(scores - ref_f32)))

    print("KERNEL_OK")
</pallas_src>

<mosaic_0001>
module attributes {stable_mosaic.version = 11 : i64} {
  func.func @_fpn_cls_kernel(%arg0: i32, %arg1: i32, %arg2: memref<24x64xbf16, #tpu.memory_space<vmem>>, %arg3: memref<64x256xbf16, #tpu.memory_space<vmem>>, %arg4: memref<1x256xf32, #tpu.memory_space<vmem>>, %arg5: memref<24x256xf32, #tpu.memory_space<vmem>>) attributes {dimension_semantics = [#tpu.dimension_semantics<parallel>, #tpu.dimension_semantics<parallel>], iteration_bounds = array<i64: 1, 7>, scalar_prefetch = 0 : i64, scratch_operands = 0 : i64, tpu.core_type = #tpu.core_type<tc>, window_params = [{transform_indices = @transform_0, window_bounds = array<i64: 24, 64>}, {transform_indices = @transform_1, window_bounds = array<i64: 64, 256>}, {transform_indices = @transform_2, window_bounds = array<i64: 1, 256>}, {transform_indices = @transform_3, window_bounds = array<i64: 24, 256>}]} {
    %c0 = arith.constant 0 : index
    %c0_0 = arith.constant 0 : index
    %0 = vector.load %arg2[%c0, %c0_0] : memref<24x64xbf16, #tpu.memory_space<vmem>>, vector<24x64xbf16>
    %c0_1 = arith.constant 0 : index
    %c0_2 = arith.constant 0 : index
    %1 = vector.load %arg3[%c0_1, %c0_2] : memref<64x256xbf16, #tpu.memory_space<vmem>>, vector<64x256xbf16>
    %cst = arith.constant dense<0.000000e+00> : vector<24x256xf32>
    %2 = tpu.matmul %0, %1, %cst {dimension_numbers = #tpu.dot_dimension_numbers<[1], [0], [0], [1], [0, 0, 1, 1], [], []>} : vector<24x64xbf16>, vector<64x256xbf16>, vector<24x256xf32> -> vector<24x256xf32>
    %c0_3 = arith.constant 0 : index
    %c0_4 = arith.constant 0 : index
    %3 = vector.load %arg4[%c0_3, %c0_4] : memref<1x256xf32, #tpu.memory_space<vmem>>, vector<1x256xf32>
    %4 = vector.broadcast %3 : vector<1x256xf32> to vector<24x256xf32>
    %5 = arith.addf %2, %4 : vector<24x256xf32>
    %c0_5 = arith.constant 0 : index
    %c0_6 = arith.constant 0 : index
    %6 = vector.load %arg5[%c0_5, %c0_6] : memref<24x256xf32, #tpu.memory_space<vmem>>, vector<24x256xf32>
    tpu.vector_store %arg5[%c0_5, %c0_6], %5 {strides = array<i32>} : memref<24x256xf32, #tpu.memory_space<vmem>>, vector<24x256xf32>,
    return
  }
  func.func @transform_0(%arg0: i32, %arg1: i32) -> (i32, i32) {
    %c0_i32 = arith.constant 0 : i32
    %c0_i32_0 = arith.constant 0 : i32
    return %arg0, %c0_i32 : i32, i32
  }
  func.func @transform_1(%arg0: i32, %arg1: i32) -> (i32, i32) {
    %c0_i32 = arith.constant 0 : i32
    %c0_i32_0 = arith.constant 0 : i32
    return %c0_i32, %arg1 : i32, i32
  }
  func.func @transform_2(%arg0: i32, %arg1: i32) -> (i32, i32) {
    %c0_i32 = arith.constant 0 : i32
    %c0_i32_0 = arith.constant 0 : i32
    return %c0_i32, %arg1 : i32, i32
  }
  func.func @transform_3(%arg0: i32, %arg1: i32) -> (i32, i32) {
    %c0_i32 = arith.constant 0 : i32
    return %arg0, %arg1 : i32, i32
  }
}

</mosaic_0001>

<bundles_post_ra>
// kernel: tpu_custom_call.1
= control target key start
LH: loop header
LB: loop body
LE: loop exit
PB: predicated region body
PF: predicated region fallthrough
CT: control target
= control target key end

     0   :  { %s1147_s0 = inlined_call_operand.hbm [shape: bf16[24,64], index: 0, kind: input, shape index: {}]   ;;  %s1148_s1 = inlined_call_operand.hbm [shape: bf16[64,1792], index: 1, kind: input, shape index: {}]   ;;  %s1149_s2 = inlined_call_operand.hbm [shape: f32[1,1792], index: 2, kind: input, shape index: {}]   ;;  %s1150_s3 = inlined_call_operand.hbm [shape: f32[24,1792], index: 3, kind: output, shape index: {}]  }
   0x1   :  { %1159 = sst [smem:[#allocation13_spill]] %s1148_s1 }
   0x2   :  { %8 = vsyncpa [#allocation3], 0 }
   0x3   :  { %9 = vsyncpa [#allocation6], 0 }
   0x4   :  { %11 = vsyncpa [#allocation6 + $0x1], 0 }
   0x5   :  { %12 = vsyncpa [#allocation4], 0 }
   0x6   :  { %14 = vsyncpa [#allocation4 + $0x1], 0  ;;  %s890_s12 = smov 0   ;;  %s892_s13 = smov 0  }
   0x7   :  { %s894_s14 = smov 0   ;;  %s896_s15 = smov 0  }
   0x8   :  { %s898_s16 = smov 0   ;;  %s900_s17 = smov 0  }
   0x9 LB: > { %s29_s18 = sadd.s32 1, %s851_s16  ;;  %s65_s19 = sadd.s32 1, %s843_s14  ;;  %s855_s17 = sphi %s900_s17, %s20_s17   ;;  %s851_s16 = sphi %s898_s16, %s1182_s16   ;;  %s847_s15 = sphi %s896_s15, %s1181_s15   ;;  %s843_s14 = sphi %s894_s14, %s1180_s14   ;;  %s839_s13 = sphi %s892_s13, %s1179_s13   ;;  %s835_s12 = sphi %s890_s12, %s1178_s12  }
   0xa   : > { %p30_p0 = scmp.ge.s32.totalorder %s29_s18, 7  ;;  %p72_p1 = scmp.ne.s32.totalorder %s843_s14, %s839_s13 }
   0xb   : > { %p73_p2 = scmp.eq.s32.totalorder %s855_s17, 0  ;;  %p606_p4 = scmp.lt.s32.totalorder %s855_s17, 7 }
   0xc   : > { %s1184_s18 = smov (%p30_p0, %s29_s18), 0  ;;  %s172_s21 = sand.u32 1, %s855_s17  }
   0xd   : > { %1160 = sst [smem:[#allocation12_spill]] %s1184_s18  ;;  %p74_p3 = por %p73_p2, %p72_p1 }
   0xe   : > { %s62_s20 = ssub.s32 %s851_s16, %s1184_s18  ;;  %s174_s22 = sand.u32 1, %s843_s14  }
   0xf   : > { %p63_p5 = scmp.eq.s32.totalorder %s62_s20, 0  ;;  %s568_s23 = sshll.u32 %s851_s16, 7 }
  0x10   : > { %s542_s25 = sshll.u32 %s174_s22, 6  ;;  %s1161_s1 = sld [smem:[#allocation13_spill]] }
  0x11   : > { %s937_s24 = scalar_select %p63_p5, %s843_s14, %s65_s19  }
  0x12   : > { %p946_p6 = pnand %p606_p4, %p74_p3  ;;  %s176_s30 = scalar_lea.vmem [#allocation5], %s542_s25 }
  0x13   : > { %s183_s4 = sshll.u32 %s176_s30, 4  ;;  %s952_s5 = scalar_lea.sflag [#allocation6], %s172_s21  ;;  %s950_s4 = int_to_ptr.vmem [resolvable:$true] %s183_s4 }
  0x14   : > { %s1162_s29 = scalar_select %p946_p6, 1, 0 }
  0x15   : > { %p1153_p8 = pneg %p946_p6 }
  0x16   : > { %s944_s28 = scalar_lea.hbm %s1161_s1, %s568_s23  ;;  %s686_s9 = scalar_lea.hbm %s1161_s1, 7168 }
  0x17   : > { %s681_s6 = scalar_lea.hbm %s944_s28, 1024  ;;  %p687_p11 = scmp.lt.u32.totalorder %s944_s28, %s1161_s1 }
  0x18   : > { %p682_p7 = scmp.ne.s32.totalorder %s944_s28, %s681_s6  ;;  %p688_p12 = scmp.lt.u32.totalorder %s686_s9, %s681_s6 }
  0x19   : > { %p690_p0 = scmp.lt.u32.totalorder %s681_s6, %s944_s28 }
  0x1a   : > { %p684_p9 = pnand %p1153_p8, %p682_p7  ;;  %p689_p13 = por %p688_p12, %p687_p11 }
  0x1c   : > { %p685_p10 = pneg %p684_p9  ;;  %p691_p2 = por %p690_p0, %p689_p13 }
  0x1e   : > { %p692_p3 = pnand %p691_p2, %p685_p10 }
  0x20   : > { %695 = shalt.err (!%p692_p3)
}
  0x21   : > { %s696_s19 = scalar_lea.vmem %s950_s4, 1024  ;;  %s857_s20 = smov [#allocation5]  }
  0x22   : > { %p697_p4 = scmp.ne.s32.totalorder %s950_s4, %s696_s19  ;;  %s701_s21 = sshll.u32 %s857_s20, 4  ;;  %s702_s21 = int_to_ptr.vmem [resolvable:$false] %s701_s21 }
  0x23   : > { %s703_s23 = scalar_lea.vmem %s702_s21, 2048  ;;  %p704_p9 = scmp.lt.s32.totalorder %s950_s4, %s702_s21 }
  0x24   : > { %p699_p5 = pnand %p697_p4, %p1153_p8  ;;  %p705_p11 = scmp.lt.s32.totalorder %s703_s23, %s696_s19 }
  0x26   : > { %p700_p7 = pneg %p699_p5  ;;  %p706_p12 = por %p705_p11, %p704_p9 }
  0x28   : > { %p707_p13 = pnand %p706_p12, %p700_p7 }
  0x2a   : > { %710 = shalt.err (!%p707_p13)
}
  0x2b   : > { %s858_s25 = smov 896   ;;  %s859_s26 = smov 128  }
  0x2c   : > { %s860_s27 = smov 8   ;;  %s981_s30 = sadd.s32 4294967295, %s855_s17  }
  0x2d   : > { %597 = dma.hbm_to_vmem [thread:$0]  (!%p946_p6), %s944_s28, 1024, %s950_s4, %s952_s5, %s858_s25, %s859_s26, %s860_s27  }
  0x2e   : > { %s538_s6 = sadd.s32 4294967294, %s855_s17   ;;  %p78_p10 = scmp.ne.s32.totalorder %s839_s13, %s835_s12 }
  0x2f   : > { %p1152_p0 = scmp.eq.s32.totalorder %s981_s30, 0  ;;  %p130_p2 = scmp.eq.s32.totalorder %s981_s30, 6 }
  0x30   : > { %p136_p3 = scmp.eq.s32.totalorder %s538_s6, 6  ;;  %p539_p5 = scmp.ge.s32.totalorder %s855_s17, 1 }
  0x31   : > { %p990_p4 = por %p1152_p0, %p78_p10  ;;  %p998_p7 = por %p130_p2, %p72_p1 }
  0x32   : > { %p1002_p9 = por %p136_p3, %p78_p10  ;;  %p143_p11 = scmp.lt.s32.totalorder %s855_s17, 8 }
  0x33   : > { %s1163_s7 = scalar_select %p990_p4, 1, 0 }
  0x34   : > { %s1164_s28 = scalar_select %p998_p7, 1, 0 }
  0x35   : > { %s1165_s4 = scalar_select %p1002_p9, 1, 0 }
  0x36   : > { %p1007_p12 = pnand %p539_p5, %p143_p11  ;;  %s861_s9 = smov [#allocation2]  }
  0x37   : > { %s158_s10 = sshll.u32 %s861_s9, 4  ;;  %s545_s11 = sshll.u32 %s174_s22, 1  ;;  %s1011_s10 = int_to_ptr.vmem [resolvable:$true] %s158_s10 }
  0x38   : > { %s1166_s8 = scalar_select %p1007_p12, 1, 0 }
  0x39   : > { %p590_p13 = pneg %p1007_p12  ;;  %s569_s19 = sshll.u32 %s851_s16, 5 }
  0x3a   : > { %s1027_s25 = scalar_lea.hbm %s1149_s2, %s569_s19  ;;  %s197_s26 = scalar_lea.vmem [#allocation7], %s545_s11 }
  0x3b   : > { %p1020_p1 = pnand %p590_p13, %p1152_p0  ;;  %s205_s27 = sshll.u32 %s197_s26, 4  ;;  %s1029_s27 = int_to_ptr.vmem [resolvable:$true] %s205_s27 }
  0x3c   : > { %s711_s22 = scalar_lea.hbm %s1147_s0, 192 }
  0x3d   : > { %p712_p10 = scmp.ne.s32.totalorder %s1147_s0, %s711_s22  ;;  %p713_p2 = pneg %p1020_p1 }
  0x3e   : > { %p718_p11 = scmp.lt.u32.totalorder %s711_s22, %s1147_s0 }
  0x3f   : > { %p714_p3 = pnand %p713_p2, %p712_p10 }
  0x41   : > { %p715_p5 = pneg %p714_p3 }
  0x43   : > { %p720_p13 = pnand %p718_p11, %p715_p5 }
  0x45   : > { %723 = shalt.err (!%p720_p13)
}
  0x46   : > { %s724_s11 = scalar_lea.vmem %s1011_s10, 192  ;;  %p732_p7 = scmp.lt.s32.totalorder %s1011_s10, %s1011_s10 }
  0x47   : > { %p725_p0 = scmp.ne.s32.totalorder %s1011_s10, %s724_s11  ;;  %p733_p4 = scmp.lt.s32.totalorder %s724_s11, %s724_s11 }
  0x49   : > { %p727_p8 = pnand %p725_p0, %p713_p2  ;;  %p734_p12 = por %p733_p4, %p732_p7 }
  0x4b   : > { %p728_p9 = pneg %p727_p8 }
  0x4d   : > { %p735_p6 = pnand %p734_p12, %p728_p9 }
  0x4f   : > { %738 = shalt.err (!%p735_p6)
}
  0x50   : > { %s862_s1 = smov 64   ;;  %s863_s18 = smov 4  }
  0x51   : > { %593 = dma.hbm_to_vmem [thread:$0]  (!%p1020_p1), %s1147_s0, 192, %s1011_s10, [#allocation3], %s862_s1, %s862_s1, %s863_s18  }
  0x52   : > { %s739_s6 = scalar_lea.hbm %s1027_s25, 32  ;;  %p1168_p0 = scmp.ne.s32.totalorder %s1162_s29, 0 }
  0x53   : > { %p740_p8 = scmp.ne.s32.totalorder %s1027_s25, %s739_s6  ;;  %s744_s21 = scalar_lea.hbm %s1149_s2, 224 }
  0x54   : > { %p1169_p4 = pneg %p1168_p0  ;;  %p745_p9 = scmp.lt.u32.totalorder %s1027_s25, %s1149_s2 }
  0x55   : > { %p746_p12 = scmp.lt.u32.totalorder %s744_s21, %s739_s6  ;;  %p748_p2 = scmp.lt.u32.totalorder %s739_s6, %s1027_s25 }
  0x56   : > { %p742_p7 = pnand %p740_p8, %p1169_p4 }
  0x57   : > { %p747_p10 = por %p746_p12, %p745_p9 }
  0x58   : > { %p743_p6 = pneg %p742_p7 }
  0x59   : > { %p749_p3 = por %p748_p2, %p747_p10 }
  0x5b   : > { %p750_p5 = pnand %p749_p3, %p743_p6 }
  0x5d   : > { %753 = shalt.err (!%p750_p5)
}
  0x5e   : > { %s754_s10 = scalar_lea.vmem %s1029_s27, 32  ;;  %p1170_p11 = pmov %p1169_p4 }
  0x5f   : > { %p755_p1 = scmp.ne.s32.totalorder %s1029_s27, %s754_s10  ;;  %s864_s20 = smov [#allocation7]  }
  0x60   : > { %s759_s1 = sshll.u32 %s864_s20, 4  ;;  %s760_s1 = int_to_ptr.vmem [resolvable:$false] %s759_s1 }
  0x61   : > { %p757_p13 = pnand %p755_p1, %p1170_p11  ;;  %s761_s18 = scalar_lea.vmem %s760_s1, 64 }
  0x62   : > { %p762_p4 = scmp.lt.s32.totalorder %s1029_s27, %s760_s1  ;;  %p763_p7 = scmp.lt.s32.totalorder %s761_s18, %s754_s10 }
  0x63   : > { %p758_p8 = pneg %p757_p13 }
  0x64   : > { %p764_p9 = por %p763_p7, %p762_p4 }
  0x66   : > { %p765_p12 = pnand %p764_p9, %p758_p8 }
  0x68   : > { %768 = shalt.err (!%p765_p12)
}
  0x69   : > { %600 = dma.hbm_to_vmem [thread:$0]  (!%p1168_p0), %s1027_s25, 32, %s1029_s27, %s952_s5  }
  0x6a   : > { %p1171_p6 = scmp.ne.s32.totalorder %s1166_s8, 0 }
  0x6b   : > { %p1172_p10 = scmp.eq.s32.totalorder (!%p1171_p6), %s981_s30, 0 }
  0x6c   : > { %214 = sbr.rel (%p1171_p6) target bundleno = 372 (0x174), region = 32 }
  0x73   : > { %822 = dma.done.wait (%p1172_p10), [#allocation3], 192   ;;  %p1173_p2 = pmov %p1172_p10 }
  0x74   : > { %s220_s19 = sand.u32 1, %s981_s30   ;;  %s1084_s26 = sand.u32 1, %s839_s13  }
  0x75   : > { %824 = vsyncadd (%p1173_p2), [#allocation3], 4294967104  ;;  %s550_s29 = sshll.u32 %s1084_s26, 6  ;;  %s221_s6 = scalar_lea.sflag [#allocation6], %s220_s19 }
  0x76   : > { %s224_s9 = scalar_lea.vmem [#allocation5], %s550_s29  ;;  %p1174_p0 = scmp.ne.s32.totalorder %s1163_s7, 0 }
  0x78   : > { %826 = dma.done.wait (%p1174_p0), %s221_s6, 1056  }
  0x79   : > { %828 = vsyncadd (%p1174_p0), %s221_s6, 4294966240  ;;  %v865_v0 = vmov 0   ;;  %v667_v1 = vld [vmem:[%s224_s9 + $0x4] ss:$8 sps:$4 sm:$0xff]   ;;  %v669_v2 = vld [vmem:[%s224_s9] ss:$8 sps:$4 sm:$0xff]   ;;  %v280_v11 = vlaneseq }
  0x7a   : > { %377 = vmatprep.mubr.bf16.mxu0 %v865_v0  ;;  %387 = vmatprep.mubr.bf16.mxu1 %v865_v0  ;;  %v670_v3 = vld [vmem:[%s224_s9 + $0x14] ss:$8 sps:$4 sm:$0xff]   ;;  %v672_v4 = vld [vmem:[%s224_s9 + $0x10] ss:$8 sps:$4 sm:$0xff]   ;;  %v673_v5 = vld [vmem:[%s224_s9 + $0x24] ss:$8 sps:$4 sm:$0xff]  }
  0x7b   : > { %345 = vmatprep.subr.bf16.mxu0 %v667_v1  ;;  %571 = vmatprep.subr.bf16.mxu1 %v667_v1  ;;  %v675_v6 = vld [vmem:[%s224_s9 + $0x20] ss:$8 sps:$4 sm:$0xff]   ;;  %v676_v7 = vld [vmem:[%s224_s9 + $0x34] ss:$8 sps:$4 sm:$0xff]   ;;  %v678_v8 = vld [vmem:[%s224_s9 + $0x30] ss:$8 sps:$4 sm:$0xff]  }
  0x7c   : > { %346 = vmatpush1.bf16.msra.mxu0 %v669_v2  ;;  %575 = vmatpush1.bf16.msra.mxu1 %v669_v2  ;;  %v679_v9 = vld [vmem:[#allocation2] sm:$0xff]   ;;  %v680_v10 = vld [vmem:[#allocation2 + $0x8] ss:$0 sps:$4 sm:$0xff]   ;;  %vm338_vm0 = vcmask 523264   ;;  %s551_s5 = sshll.u32 %s1084_s26, 1  ;;  %v281_v12 = vshrl.u32 %v280_v11, 7 }
  0x7d   : > { %347 = vmatprep.subr.bf16.mxu0 %v670_v3  ;;  %572 = vmatprep.subr.bf16.mxu1 %v670_v3  ;;  %s579_s30 = smul.u32 48, %s1084_s26  ;;  %s233_s7 = scalar_lea.vmem [#allocation7], %s551_s5 }
  0x7e   : > { %v282_v13 = vsub.s32 0, %v281_v12  ;;  %v278_v14 = vld [vmem:[%s233_s7] sm:$0x3]  ;;  %v286_v15 = vsub.s32 1, %v281_v12  ;;  %s570_s27 = sshll.u32 %s847_s15, 8  ;;  %s403_s23 = scalar_lea.sflag [#allocation4], %s1084_s26 }
  0x7f   : > { %s260_s8 = scalar_lea.vmem [#allocation8], %s579_s30  ;;  %s1099_s21 = scalar_lea.hbm %s1150_s3, %s570_s27 }
  0x80   : > { %348 = vmatpush1.bf16.msra.mxu0 %v672_v4  ;;  %576 = vmatpush1.bf16.msra.mxu1 %v672_v4  ;;  %v283_v16 = vrot.slane %v278_v14, %v282_v13  ;;  %v287_v17 = vrot.slane %v278_v14, %v286_v15  ;;  %s419_s25 = sshll.u32 %s260_s8, 4  ;;  %p1175_p5 = scmp.ne.s32.totalorder %s1164_s28, 0  ;;  %s1094_s25 = int_to_ptr.vmem [resolvable:$true] %s419_s25 }
  0x81   : > { %349 = vmatprep.subr.bf16.mxu0 %v673_v5  ;;  %573 = vmatprep.subr.bf16.mxu1 %v673_v5  ;;  %s769_s11 = scalar_lea.vmem %s1094_s25, 768  ;;  %s866_s10 = smov [#allocation8]  }
  0x82   : > { %p770_p3 = scmp.ne.s32.totalorder %s1094_s25, %s769_s11  ;;  %s773_s20 = sshll.u32 %s866_s10, 4  ;;  %s774_s20 = int_to_ptr.vmem [resolvable:$false] %s773_s20 }
  0x83   : > { %s775_s1 = scalar_lea.vmem %s774_s20, 1536  ;;  %p776_p13 = scmp.lt.s32.totalorder %s1094_s25, %s774_s20 }
  0x84   : > { %350 = vmatpush1.bf16.msra.mxu0 %v675_v6  ;;  %577 = vmatpush1.bf16.msra.mxu1 %v675_v6  ;;  %p771_p1 = pnand %p770_p3, %p1175_p5  ;;  %p777_p8 = scmp.lt.s32.totalorder %s775_s1, %s769_s11 }
  0x85   : > { %351 = vmatprep.subr.bf16.mxu0 %v676_v7  ;;  %574 = vmatprep.subr.bf16.mxu1 %v676_v7 }
  0x86   : > { %p772_p11 = pneg %p771_p1  ;;  %p778_p4 = por %p777_p8, %p776_p13 }
  0x88   : > { %352 = vmatpush1.bf16.msra.mxu0 %v678_v8  ;;  %578 = vmatpush1.bf16.msra.mxu1 %v678_v8  ;;  %p779_p7 = pnand %p778_p4, %p772_p11 }
  0x8b   : > { %562 = vmatmul.mubr.msk.bf16.vlgmr.msra.gmra.mrb[0].mxu0 %vm338_vm0, %v679_v9  ;;  %563 = vmatmul.mubr.msk.bf16.vlgmr.msra.gmra.mrb[0].mxu1 %vm338_vm0, %v680_v10 }
 0x15e   : > { %v379_v18 = vpop.f32.mrb[0].mxu0  ;;  %v389_v19 = vpop.f32.mrb[0].mxu1 }
 0x15f   : > { %v380_v20 = vadd.f32 %v379_v18, %v283_v16  ;;  %v390_v21 = vadd.f32 %v389_v19, %v283_v16  ;;  %v381_v22 = vpop.f32.mrb[1].mxu0  ;;  %v391_v23 = vpop.f32.mrb[1].mxu1 }
 0x160   : > { %v382_v24 = vadd.f32 %v381_v22, %v287_v17  ;;  %v392_v25 = vadd.f32 %v391_v23, %v287_v17  ;;  %v383_v26 = vpop.f32.mrb[2].mxu0  ;;  %v393_v27 = vpop.f32.mrb[2].mxu1 }
 0x161   : > { %396 = vst [vmem:[%s260_s8] sm:$0xff] %v380_v20  ;;  %400 = vst [vmem:[%s260_s8 + $0x20] sm:$0xff] %v390_v21  ;;  %v384_v28 = vadd.f32 %v383_v26, %v283_v16  ;;  %v385_v29 = vpop.f32.mrb[3].mxu0  ;;  %v394_v30 = vpop.f32.mrb[3].mxu1 }
 0x162   : > { %397 = vst [vmem:[%s260_s8 + $0x8] sm:$0xff] %v382_v24  ;;  %401 = vst [vmem:[%s260_s8 + $0x28] sm:$0xff] %v392_v25  ;;  %v386_v31 = vadd.f32 %v385_v29, %v287_v17 }
 0x163   : > { %398 = vst [vmem:[%s260_s8 + $0x10] sm:$0xff] %v384_v28 }
 0x164   : > { %399 = vst [vmem:[%s260_s8 + $0x18] sm:$0xff] %v386_v31 }
 0x165   : > { %782 = shalt.err (!%p779_p7)
}
 0x166   : > { %s783_s18 = scalar_lea.hbm %s1099_s21, 768  ;;  %s787_s6 = scalar_lea.hbm %s1150_s3, 5376 }
 0x167   : > { %p784_p9 = scmp.ne.s32.totalorder %s1099_s21, %s783_s18  ;;  %p788_p10 = scmp.lt.u32.totalorder %s1099_s21, %s1150_s3 }
 0x168   : > { %p789_p2 = scmp.lt.u32.totalorder %s787_s6, %s783_s18  ;;  %p791_p3 = scmp.lt.u32.totalorder %s783_s18, %s1099_s21 }
 0x169   : > { %p785_p12 = pnand %p784_p9, %p1175_p5 }
 0x16a   : > { %p790_p0 = por %p789_p2, %p788_p10 }
 0x16b   : > { %p786_p6 = pneg %p785_p12 }
 0x16c   : > { %p792_p1 = por %p791_p3, %p790_p0 }
 0x16e   : > { %p793_p11 = pnand %p792_p1, %p786_p6 }
 0x170   : > { %796 = shalt.err (!%p793_p11)
}
 0x171   : > { %s867_s30 = smov 256   ;;  %s868_s7 = smov 1792  }
 0x172   : > { %s869_s8 = smov 16  }
 0x173   : > { %588 = dma.vmem_to_hbm [thread:$0]  (%p1175_p5), %s1094_s25, 768, %s1099_s21, %s403_s23, %s867_s30, %s868_s7, %s869_s8  }
 0x174 PF: > { %p608_p13 = scmp.ge.s32.totalorder %s855_s17, 2  ;;  %s434_s27 = sand.u32 1, %s835_s12  }
 0x175   : > { %p1176_p8 = scmp.ne.s32.totalorder %s1165_s4, 0  ;;  %s435_s15 = scalar_lea.sflag [#allocation4], %s434_s27 }
 0x177   : > { %p602_p4 = pnand %p608_p13, %p1176_p8 }
 0x179   : > { %830 = dma.done.wait (!%p602_p4), %s435_s15, 768  }
 0x17a   : > { %832 = vsyncadd (!%p602_p4), %s435_s15, 4294966528  ;;  %s20_s17 = sadd.s32 1, %s855_s17   ;;  %s1177_s28 = sld [smem:[#allocation12_spill]] }
 0x17b   : > { %p17_p7 = scmp.ge.s32.totalorder %s20_s17, 9   ;;  %s1178_s12 = smov %s839_s13 }
 0x17c   : > { %s1179_s13 = smov %s843_s14  ;;  %s1180_s14 = smov %s937_s24 }
 0x17d   : > { %s1181_s15 = smov %s851_s16  ;;  %19 = sbr.rel (!%p17_p7) target bundleno = 9 (0x9), region = 94 }
 0x180   : > { %s1182_s16 = smov %s1177_s28 }
 0x184   :  { %440 = vsyncpa [#allocation3], 1 }
 0x185   :  { %442 = vsyncpa [#allocation3 + $0x1], 1 }
 0x186   :  { %443 = vsyncpa [#allocation6], 1 }
 0x187   :  { %445 = vsyncpa [#allocation6 + $0x1], 1 }
 0x188   :  { %446 = vsyncpa [#allocation4], 1 }
 0x189   :  { %448 = vsyncpa [#allocation4 + $0x1], 1 }

</bundles_post_ra>
